<compile_context>
chip_gen: v7x
topology: tpu7x:2x2x1
jax: 0.10.0
libtpu: 0.0.40
codegen_flags: <defaults>
</compile_context>

<pallas_src>
import jax
import jax.numpy as jnp
from jax.experimental import pallas as pl
from jax.experimental.pallas import tpu as pltpu


def _gelu_exact(v):
    # nn.GELU() default in PyTorch is the exact erf formulation (f32 math).
    return 0.5 * v * (1.0 + jax.lax.erf(v * jnp.float32(0.7071067811865476)))


def dino_head_kernel(x_ref, w1_ref, b1_ref, w2_ref, b2_ref, w3_ref, b3_ref,
                     w4_ref, o_ref, z_ref):
    # ---- Phase 1: once per batch tile (first out_dim tile): MLP + normalize.
    @pl.when(pl.program_id(1) == 0)
    def _():
        h = jnp.dot(x_ref[...], w1_ref[...], preferred_element_type=jnp.float32)
        h = _gelu_exact(h + b1_ref[...])
        h = jnp.dot(h.astype(jnp.bfloat16), w2_ref[...],
                    preferred_element_type=jnp.float32)
        h = _gelu_exact(h + b2_ref[...])
        z = jnp.dot(h.astype(jnp.bfloat16), w3_ref[...],
                    preferred_element_type=jnp.float32) + b3_ref[...]
        # F.normalize(z, dim=-1): z / max(||z||, 1e-12)
        #   == z * rsqrt(max(sum(z^2), 1e-24)); rsqrt runs on the EUP slot.
        ss = jnp.sum(z * z, axis=-1, keepdims=True)
        inv = jax.lax.rsqrt(jnp.maximum(ss, jnp.float32(1e-24)))
        z_ref[...] = (z * inv).astype(z_ref.dtype)

    # ---- Phase 2: every (i, j): one streamed W4 column-tile matmul.
    o_ref[...] = jnp.dot(z_ref[...], w4_ref[...],
                         preferred_element_type=jnp.float32).astype(o_ref.dtype)


def _physical_vmem_bytes():
    try:
        cap = getattr(pltpu.get_tpu_info(), "vmem_capacity_bytes", None)
        if cap:
            return int(cap)
    except Exception:
        pass
    # Conservative fallback: v7x has 64 MiB/TC (v5e/v6e have 128 MiB).
    return 64 * 1024 * 1024


def _pick_tile_m(b):
    # Large batch tiles amortize the per-tile re-read of the whole W4 stream,
    # but keep >= 2 batch tiles so both v7x TensorCores get work when possible.
    for cand in (512, 256, 128, 64, 32, 16, 8):
        if cand <= b and b % cand == 0 and b // cand >= 2:
            return cand
    return b  # tiny batch: single full-batch tile (block == full dim is legal)


def _pick_tile_n(out_dim):
    # Wide, lane-dense W4 column tiles: fewer grid steps, unmasked stores.
    for cand in (1024, 512, 256, 128):
        if cand <= out_dim and out_dim % cand == 0:
            return cand
    return out_dim


def _vmem_estimate(tm, tn, in_dim, hidden, bottleneck, w4_buffers, out_bytes):
    resident_w = (in_dim * hidden + hidden * hidden + hidden * bottleneck) * 2
    resident_b = (2 * hidden + bottleneck) * 4
    x_tile = 2 * tm * in_dim * 2            # bf16 x, double-buffered
    w4_tile = w4_buffers * bottleneck * tn * 2
    out_tile = 2 * tm * tn * out_bytes
    z_scratch = tm * bottleneck * 2
    return resident_w + resident_b + x_tile + w4_tile + out_tile + z_scratch


def dino_head_forward(x, params, *, tile_m=None, tile_n=None,
                      out_dtype=jnp.bfloat16):
    b, in_dim = x.shape
    hidden = params["w1"].shape[1]
    bottleneck = params["w3"].shape[1]
    out_dim = params["w4"].shape[1]

    tm = tile_m if tile_m is not None else _pick_tile_m(b)
    tn = min(tile_n, out_dim) if tile_n is not None else _pick_tile_n(out_dim)

    out_bytes = jnp.dtype(out_dtype).itemsize
    vmem_cap = int(_physical_vmem_bytes() * 0.85)
    w4_buffers = 3 if (out_dim // tn) >= 3 else 2

    # Shrink auto-picked tiles if the footprint exceeds this chip's VMEM
    # (v7x: 64 MiB/TC vs 128 MiB on v5e/v6e).
    if tile_n is None:
        while (_vmem_estimate(tm, tn, in_dim, hidden, bottleneck, w4_buffers,
                              out_bytes) > vmem_cap
               and tn > 128 and tn % 256 == 0):
            tn //= 2
    if tile_m is None:
        while (_vmem_estimate(tm, tn, in_dim, hidden, bottleneck, w4_buffers,
                              out_bytes) > vmem_cap
               and tm > 8 and tm % 16 == 0 and b % (tm // 2) == 0):
            tm //= 2

    # TODO(synk): pad ragged batch / out_dim to tile multiples instead of asserting.
    assert b % tm == 0 and out_dim % tn == 0
    assert (tm % 8 == 0) or tm == b, "batch tile must be 8-aligned or the full batch"
    assert (tn % 128 == 0) or tn == out_dim, "out tile must be 128-aligned or full"
    assert in_dim % 128 == 0 and hidden % 128 == 0 and bottleneck % 128 == 0

    needed = _vmem_estimate(tm, tn, in_dim, hidden, bottleneck, w4_buffers,
                            out_bytes)
    vmem_limit = min(max(int(needed * 1.25) + (4 << 20), 32 << 20), vmem_cap)

    resident = pl.Buffered(1)  # constant index_map -> fetch once, stay resident
    grid = (b // tm, out_dim // tn)

    grid_spec = pltpu.PrefetchScalarGridSpec(
        num_scalar_prefetch=0,
        grid=grid,
        in_specs=[
            # Activation batch tile: revisited (not re-DMA'd) across j.
            pl.BlockSpec((tm, in_dim), lambda i, j: (i, 0)),
            # MLP weights/biases: single-buffered residents.
            pl.BlockSpec((in_dim, hidden), lambda i, j: (0, 0),
                         pipeline_mode=resident),
            pl.BlockSpec((1, hidden), lambda i, j: (0, 0),
                         pipeline_mode=resident),
            pl.BlockSpec((hidden, hidden), lambda i, j: (0, 0),
                         pipeline_mode=resident),
            pl.BlockSpec((1, hidden), lambda i, j: (0, 0),
                         pipeline_mode=resident),
            pl.BlockSpec((hidden, bottleneck), lambda i, j: (0, 0),
                         pipeline_mode=resident),
            pl.BlockSpec((1, bottleneck), lambda i, j: (0, 0),
                         pipeline_mode=resident),
            # Last-layer weight: streamed column tiles; deeper pipelining hides
            # the phase-1 MLP bubble at j == 0 of every batch tile.
            pl.BlockSpec((bottleneck, tn), lambda i, j: (0, j),
                         pipeline_mode=pl.Buffered(w4_buffers)),
        ],
        out_specs=pl.BlockSpec((tm, tn), lambda i, j: (i, j)),
        # Normalized bottleneck activation cached across the out_dim loop.
        scratch_shapes=[pltpu.VMEM((tm, bottleneck), jnp.bfloat16)],
    )
    # TODO(synk): optional fp8 storage/stream for W4 on v7x (fp8 MXU) behind a
    # flag; numerics-affecting, must be validated against the DINO loss.
    return pl.pallas_call(
        dino_head_kernel,
        out_shape=jax.ShapeDtypeStruct((b, out_dim), out_dtype),
        grid_spec=grid_spec,
        compiler_params=pltpu.CompilerParams(
            # batch tiles -> both v7x TensorCores; out_dim axis carries scratch.
            dimension_semantics=("parallel", "arbitrary"),
            vmem_limit_bytes=vmem_limit,
        ),
    )(x.astype(jnp.bfloat16), params["w1"], params["b1"], params["w2"],
      params["b2"], params["w3"], params["b3"], params["w4"])


def init_dino_head_params(key, in_dim, out_dim, hidden_dim, bottleneck_dim,
                          weight_dtype=jnp.bfloat16):
    # nn.init.trunc_normal_(w, std=0.02) truncates at +/- 2 std; biases -> 0.
    def trunc_normal(k, shape, std=0.02):
        w = std * jax.random.truncated_normal(k, -2.0, 2.0, shape,
                                              dtype=jnp.float32)
        return w.astype(weight_dtype)

    k1, k2, k3, k4 = jax.random.split(key, 4)
    return {
        "w1": trunc_normal(k1, (in_dim, hidden_dim)),
        "b1": jnp.zeros((1, hidden_dim), jnp.float32),
        "w2": trunc_normal(k2, (hidden_dim, hidden_dim)),
        "b2": jnp.zeros((1, hidden_dim), jnp.float32),
        "w3": trunc_normal(k3, (hidden_dim, bottleneck_dim)),
        "b3": jnp.zeros((1, bottleneck_dim), jnp.float32),
        "w4": trunc_normal(k4, (bottleneck_dim, out_dim)),
    }


def dino_head_reference(x, p):
    f32 = lambda a: a.astype(jnp.float32)
    h = _gelu_exact(x @ f32(p["w1"]) + p["b1"])
    h = _gelu_exact(h @ f32(p["w2"]) + p["b2"])
    z = h @ f32(p["w3"]) + p["b3"]
    z = z / jnp.maximum(jnp.sqrt(jnp.sum(z * z, -1, keepdims=True)), 1e-12)
    return z @ f32(p["w4"])


if __name__ == "__main__":
    # Small but hardware-aligned shapes (128-lane feature dims) consistent with
    # DINOHead(in_dim, out_dim, hidden_dim, bottleneck_dim).
    # TODO(synk): re-validate numerics (bf16 x/activations/z scratch) at
    # production sizes (hidden=2048, out_dim=65536).
    B, IN_DIM, OUT_DIM, HIDDEN_DIM, BOTTLENECK_DIM = 16, 128, 512, 256, 128

    key = jax.random.PRNGKey(0)
    kx, kp = jax.random.split(key)
    x = jax.random.normal(kx, (B, IN_DIM), dtype=jnp.float32)
    params = init_dino_head_params(kp, IN_DIM, OUT_DIM, HIDDEN_DIM,
                                   BOTTLENECK_DIM)

    ref = dino_head_reference(x, params)

    # 1) Auto-picked tiles (tm=8 -> two batch tiles for megacore, tn=512),
    #    default bf16 output.
    out = jax.block_until_ready(dino_head_forward(x, params))
    assert out.shape == (B, OUT_DIM) and out.dtype == jnp.bfloat16
    out_f32 = out.astype(jnp.float32)
    assert jnp.allclose(out_f32, ref, rtol=3e-2, atol=5e-3), float(
        jnp.max(jnp.abs(out_f32 - ref)))

    # 2) Explicit small tiles + f32 output: exercises multi-step W4 streaming,
    #    z-scratch reuse across j, and the Buffered(3) W4 path.
    out2 = jax.block_until_ready(
        dino_head_forward(x, params, tile_m=8, tile_n=128,
                          out_dtype=jnp.float32))
    assert out2.shape == (B, OUT_DIM) and out2.dtype == jnp.float32
    assert jnp.allclose(out2, ref, rtol=3e-2, atol=5e-3), float(
        jnp.max(jnp.abs(out2 - ref)))

    print("KERNEL_OK")
</pallas_src>

<mosaic_0001>
module attributes {stable_mosaic.version = 11 : i64} {
  func.func @dino_head_kernel(%arg0: i32, %arg1: i32, %arg2: memref<8x128xbf16, #tpu.memory_space<vmem>>, %arg3: memref<128x256xbf16, #tpu.memory_space<vmem>>, %arg4: memref<1x256xf32, #tpu.memory_space<vmem>>, %arg5: memref<256x256xbf16, #tpu.memory_space<vmem>>, %arg6: memref<1x256xf32, #tpu.memory_space<vmem>>, %arg7: memref<256x128xbf16, #tpu.memory_space<vmem>>, %arg8: memref<1x128xf32, #tpu.memory_space<vmem>>, %arg9: memref<128x512xbf16, #tpu.memory_space<vmem>>, %arg10: memref<8x512xbf16, #tpu.memory_space<vmem>>, %arg11: memref<8x128xbf16, #tpu.memory_space<vmem>>) attributes {dimension_semantics = [#tpu.dimension_semantics<parallel>, #tpu.dimension_semantics<arbitrary>], iteration_bounds = array<i64: 2, 1>, scalar_prefetch = 0 : i64, scratch_operands = 1 : i64, tpu.core_type = #tpu.core_type<tc>, window_params = [{transform_indices = @transform_0, window_bounds = array<i64: 8, 128>}, {pipeline_mode = #tpu.pipeline_mode<synchronous>, transform_indices = @transform_1, window_bounds = array<i64: 128, 256>}, {pipeline_mode = #tpu.pipeline_mode<synchronous>, transform_indices = @transform_2, window_bounds = array<i64: 1, 256>}, {pipeline_mode = #tpu.pipeline_mode<synchronous>, transform_indices = @transform_3, window_bounds = array<i64: 256, 256>}, {pipeline_mode = #tpu.pipeline_mode<synchronous>, transform_indices = @transform_4, window_bounds = array<i64: 1, 256>}, {pipeline_mode = #tpu.pipeline_mode<synchronous>, transform_indices = @transform_5, window_bounds = array<i64: 256, 128>}, {pipeline_mode = #tpu.pipeline_mode<synchronous>, transform_indices = @transform_6, window_bounds = array<i64: 1, 128>}, {pipeline_mode = #tpu.pipeline_mode<double_buffered>, transform_indices = @transform_7, window_bounds = array<i64: 128, 512>}, {transform_indices = @transform_8, window_bounds = array<i64: 8, 512>}]} {
    %c0_i32 = arith.constant 0 : i32
    %0 = arith.cmpi eq, %arg1, %c0_i32 : i32
    %1 = arith.extui %0 : i1 to i32
    %c0_i32_0 = arith.constant 0 : i32
    %2 = arith.cmpi ne, %1, %c0_i32_0 : i32
    scf.if %2 {
      %c0_6 = arith.constant 0 : index
      %c0_7 = arith.constant 0 : index
      %8 = vector.load %arg2[%c0_6, %c0_7] : memref<8x128xbf16, #tpu.memory_space<vmem>>, vector<8x128xbf16>
      %c0_8 = arith.constant 0 : index
      %c0_9 = arith.constant 0 : index
      %9 = vector.load %arg3[%c0_8, %c0_9] : memref<128x256xbf16, #tpu.memory_space<vmem>>, vector<128x256xbf16>
      %cst_10 = arith.constant dense<0.000000e+00> : vector<8x256xf32>
      %10 = tpu.matmul %8, %9, %cst_10 {dimension_numbers = #tpu.dot_dimension_numbers<[1], [0], [0], [1], [0, 0, 1, 1], [], []>} : vector<8x128xbf16>, vector<128x256xbf16>, vector<8x256xf32> -> vector<8x256xf32>
      %c0_11 = arith.constant 0 : index
      %c0_12 = arith.constant 0 : index
      %11 = vector.load %arg4[%c0_11, %c0_12] : memref<1x256xf32, #tpu.memory_space<vmem>>, vector<1x256xf32>
      %12 = vector.broadcast %11 : vector<1x256xf32> to vector<8x256xf32>
      %13 = arith.addf %10, %12 : vector<8x256xf32>
      %cst_13 = arith.constant 5.000000e-01 : f32
      %14 = vector.broadcast %cst_13 : f32 to vector<8x256xf32>
      %15 = arith.mulf %14, %13 : vector<8x256xf32>
      %cst_14 = arith.constant 0.707106769 : f32
      %16 = vector.broadcast %cst_14 : f32 to vector<8x256xf32>
      %17 = arith.mulf %13, %16 : vector<8x256xf32>
      %18 = math.erf %17 : vector<8x256xf32>
      %cst_15 = arith.constant 1.000000e+00 : f32
      %19 = vector.broadcast %cst_15 : f32 to vector<8x256xf32>
      %20 = arith.addf %19, %18 : vector<8x256xf32>
      %21 = arith.mulf %15, %20 : vector<8x256xf32>
      %22 = arith.truncf %21 : vector<8x256xf32> to vector<8x256xbf16>
      %c0_16 = arith.constant 0 : index
      %c0_17 = arith.constant 0 : index
      %23 = vector.load %arg5[%c0_16, %c0_17] : memref<256x256xbf16, #tpu.memory_space<vmem>>, vector<256x256xbf16>
      %cst_18 = arith.constant dense<0.000000e+00> : vector<8x256xf32>
      %24 = tpu.matmul %22, %23, %cst_18 {dimension_numbers = #tpu.dot_dimension_numbers<[1], [0], [0], [1], [0, 0, 1, 1], [], []>} : vector<8x256xbf16>, vector<256x256xbf16>, vector<8x256xf32> -> vector<8x256xf32>
      %c0_19 = arith.constant 0 : index
      %c0_20 = arith.constant 0 : index
      %25 = vector.load %arg6[%c0_19, %c0_20] : memref<1x256xf32, #tpu.memory_space<vmem>>, vector<1x256xf32>
      %26 = vector.broadcast %25 : vector<1x256xf32> to vector<8x256xf32>
      %27 = arith.addf %24, %26 : vector<8x256xf32>
      %cst_21 = arith.constant 5.000000e-01 : f32
      %28 = vector.broadcast %cst_21 : f32 to vector<8x256xf32>
      %29 = arith.mulf %28, %27 : vector<8x256xf32>
      %cst_22 = arith.constant 0.707106769 : f32
      %30 = vector.broadcast %cst_22 : f32 to vector<8x256xf32>
      %31 = arith.mulf %27, %30 : vector<8x256xf32>
      %32 = math.erf %31 : vector<8x256xf32>
      %cst_23 = arith.constant 1.000000e+00 : f32
      %33 = vector.broadcast %cst_23 : f32 to vector<8x256xf32>
      %34 = arith.addf %33, %32 : vector<8x256xf32>
      %35 = arith.mulf %29, %34 : vector<8x256xf32>
      %36 = arith.truncf %35 : vector<8x256xf32> to vector<8x256xbf16>
      %c0_24 = arith.constant 0 : index
      %c0_25 = arith.constant 0 : index
      %37 = vector.load %arg7[%c0_24, %c0_25] : memref<256x128xbf16, #tpu.memory_space<vmem>>, vector<256x128xbf16>
      %cst_26 = arith.constant dense<0.000000e+00> : vector<8x128xf32>
      %38 = tpu.matmul %36, %37, %cst_26 {dimension_numbers = #tpu.dot_dimension_numbers<[1], [0], [0], [1], [0, 0, 1, 1], [], []>} : vector<8x256xbf16>, vector<256x128xbf16>, vector<8x128xf32> -> vector<8x128xf32>
      %c0_27 = arith.constant 0 : index
      %c0_28 = arith.constant 0 : index
      %39 = vector.load %arg8[%c0_27, %c0_28] : memref<1x128xf32, #tpu.memory_space<vmem>>, vector<1x128xf32>
      %40 = vector.broadcast %39 : vector<1x128xf32> to vector<8x128xf32>
      %41 = arith.addf %38, %40 : vector<8x128xf32>
      %42 = arith.mulf %41, %41 : vector<8x128xf32>
      %cst_29 = arith.constant dense<0.000000e+00> : vector<8xf32>
      %43 = vector.multi_reduction <add>, %42, %cst_29 [1] : vector<8x128xf32> to vector<8xf32>
      %44 = vector.shape_cast %43 : vector<8xf32> to vector<8x1xf32>
      %cst_30 = arith.constant 1.000000e-24 : f32
      %45 = vector.broadcast %cst_30 : f32 to vector<8x1xf32>
      %46 = arith.maximumf %44, %45 : vector<8x1xf32>
      %47 = math.rsqrt %46 : vector<8x1xf32>
      %48 = vector.broadcast %47 : vector<8x1xf32> to vector<8x128xf32>
      %49 = arith.mulf %41, %48 : vector<8x128xf32>
      %50 = arith.truncf %49 : vector<8x128xf32> to vector<8x128xbf16>
      %c0_31 = arith.constant 0 : index
      %c0_32 = arith.constant 0 : index
      %51 = vector.load %arg11[%c0_31, %c0_32] : memref<8x128xbf16, #tpu.memory_space<vmem>>, vector<8x128xbf16>
      tpu.vector_store %arg11[%c0_31, %c0_32], %50 {strides = array<i32>} : memref<8x128xbf16, #tpu.memory_space<vmem>>, vector<8x128xbf16>,
    } else {
    }
    %c0 = arith.constant 0 : index
    %c0_1 = arith.constant 0 : index
    %3 = vector.load %arg11[%c0, %c0_1] : memref<8x128xbf16, #tpu.memory_space<vmem>>, vector<8x128xbf16>
    %c0_2 = arith.constant 0 : index
    %c0_3 = arith.constant 0 : index
    %4 = vector.load %arg9[%c0_2, %c0_3] : memref<128x512xbf16, #tpu.memory_space<vmem>>, vector<128x512xbf16>
    %cst = arith.constant dense<0.000000e+00> : vector<8x512xf32>
    %5 = tpu.matmul %3, %4, %cst {dimension_numbers = #tpu.dot_dimension_numbers<[1], [0], [0], [1], [0, 0, 1, 1], [], []>} : vector<8x128xbf16>, vector<128x512xbf16>, vector<8x512xf32> -> vector<8x512xf32>
    %6 = arith.truncf %5 : vector<8x512xf32> to vector<8x512xbf16>
    %c0_4 = arith.constant 0 : index
    %c0_5 = arith.constant 0 : index
    %7 = vector.load %arg10[%c0_4, %c0_5] : memref<8x512xbf16, #tpu.memory_space<vmem>>, vector<8x512xbf16>
    tpu.vector_store %arg10[%c0_4, %c0_5], %6 {strides = array<i32>} : memref<8x512xbf16, #tpu.memory_space<vmem>>, vector<8x512xbf16>,
    return
  }
  func.func @transform_0(%arg0: i32, %arg1: i32) -> (i32, i32) {
    %c0_i32 = arith.constant 0 : i32
    %c0_i32_0 = arith.constant 0 : i32
    return %arg0, %c0_i32 : i32, i32
  }
  func.func @transform_1(%arg0: i32, %arg1: i32) -> (i32, i32) {
    %c0_i32 = arith.constant 0 : i32
    %c0_i32_0 = arith.constant 0 : i32
    %c0_i32_1 = arith.constant 0 : i32
    return %c0_i32, %c0_i32_0 : i32, i32
  }
  func.func @transform_2(%arg0: i32, %arg1: i32) -> (i32, i32) {
    %c0_i32 = arith.constant 0 : i32
    %c0_i32_0 = arith.constant 0 : i32
    %c0_i32_1 = arith.constant 0 : i32
    return %c0_i32, %c0_i32_0 : i32, i32
  }
  func.func @transform_3(%arg0: i32, %arg1: i32) -> (i32, i32) {
    %c0_i32 = arith.constant 0 : i32
    %c0_i32_0 = arith.constant 0 : i32
    %c0_i32_1 = arith.constant 0 : i32
    return %c0_i32, %c0_i32_0 : i32, i32
  }
  func.func @transform_4(%arg0: i32, %arg1: i32) -> (i32, i32) {
    %c0_i32 = arith.constant 0 : i32
    %c0_i32_0 = arith.constant 0 : i32
    %c0_i32_1 = arith.constant 0 : i32
    return %c0_i32, %c0_i32_0 : i32, i32
  }
  func.func @transform_5(%arg0: i32, %arg1: i32) -> (i32, i32) {
    %c0_i32 = arith.constant 0 : i32
    %c0_i32_0 = arith.constant 0 : i32
    %c0_i32_1 = arith.constant 0 : i32
    return %c0_i32, %c0_i32_0 : i32, i32
  }
  func.func @transform_6(%arg0: i32, %arg1: i32) -> (i32, i32) {
    %c0_i32 = arith.constant 0 : i32
    %c0_i32_0 = arith.constant 0 : i32
    %c0_i32_1 = arith.constant 0 : i32
    return %c0_i32, %c0_i32_0 : i32, i32
  }
  func.func @transform_7(%arg0: i32, %arg1: i32) -> (i32, i32) {
    %c0_i32 = arith.constant 0 : i32
    %c0_i32_0 = arith.constant 0 : i32
    return %c0_i32, %arg1 : i32, i32
  }
  func.func @transform_8(%arg0: i32, %arg1: i32) -> (i32, i32) {
    %c0_i32 = arith.constant 0 : i32
    return %arg0, %arg1 : i32, i32
  }
}

</mosaic_0001>

<bundles_post_ra>
// kernel: tpu_custom_call.1
= control target key start
LH: loop header
LB: loop body
LE: loop exit
PB: predicated region body
PF: predicated region fallthrough
CT: control target
= control target key end

     0   :  { %s2456_s0 = inlined_call_operand.hbm [shape: bf16[16,128], index: 0, kind: input, shape index: {}]   ;;  %s2457_s1 = inlined_call_operand.hbm [shape: bf16[128,256], index: 1, kind: input, shape index: {}]   ;;  %s2458_s2 = inlined_call_operand.vmem [shape: f32[1,256], index: 2, kind: input, shape index: {}]   ;;  %s2459_s3 = inlined_call_operand.hbm [shape: bf16[256,256], index: 3, kind: input, shape index: {}]   ;;  %s2460_s4 = inlined_call_operand.vmem [shape: f32[1,256], index: 4, kind: input, shape index: {}]   ;;  %s2461_s5 = inlined_call_operand.hbm [shape: bf16[256,128], index: 5, kind: input, shape index: {}]   ;;  %s2462_s6 = inlined_call_operand.vmem [shape: f32[1,128], index: 6, kind: input, shape index: {}]   ;;  %s2463_s7 = inlined_call_operand.hbm [shape: bf16[128,512], index: 7, kind: input, shape index: {}]   ;;  %s2464_s8 = inlined_call_operand.hbm [shape: bf16[16,512], index: 8, kind: output, shape index: {}]  }
   0x1   :  { %2473 = sst [smem:[#allocation17_spill]] %s2457_s1 }
   0x2   :  { %2474 = sst [smem:[#allocation18_spill]] %s2459_s3 }
   0x3   :  { %2475 = sst [smem:[#allocation19_spill]] %s2464_s8 }
   0x4   :  { %13 = vsyncpa [#allocation4], 0 }
   0x5   :  { %15 = vsyncpa [#allocation4 + $0x1], 0 }
   0x6   :  { %16 = vsyncpa [#allocation7], 0 }
   0x7   :  { %17 = vsyncpa [#allocation10], 0 }
   0x8   :  { %18 = vsyncpa [#allocation5], 0 }
   0x9   :  { %20 = vsyncpa [#allocation5 + $0x1], 0  ;;  %s2135_s27 = smov 0   ;;  %s2137_s28 = smov 0  }
   0xa   :  { %s2139_s29 = smov 0   ;;  %s2141_s30 = smov 0  }
   0xb   :  { %s2143_s9 = smov 0   ;;  %s2145_s10 = smov 0  }
   0xc LB: > { %s2465_s11 = sadd.s32 4294967295, %s2075_s10   ;;  %p1443_p0 = scmp.ge.s32.totalorder %s2075_s10, 1  ;;  %s2075_s10 = sphi %s2145_s10, %s26_s10   ;;  %s2071_s9 = sphi %s2143_s9, %s2501_s9   ;;  %s2067_s30 = sphi %s2141_s30, %s2500_s30   ;;  %s2063_s29 = sphi %s2139_s29, %s2499_s29   ;;  %s2059_s28 = sphi %s2137_s28, %s2498_s28   ;;  %s2055_s27 = sphi %s2135_s27, %s2497_s27  }
   0xd   : > { %p2169_p1 = scmp.eq.s32.totalorder %s2465_s11, 0  ;;  %p249_p2 = scmp.lt.s32.totalorder %s2075_s10, 3 }
   0xe   : > { %s2077_s14 = smov [#allocation6]   ;;  %s2078_s17 = smov [#allocation9]  }
   0xf   : > { %s2476_s12 = scalar_select %p2169_p1, 1, 0 }
  0x10   : > { %p2174_p3 = pnand %p1443_p0, %p249_p2  ;;  %s261_s15 = sshll.u32 %s2077_s14, 4  ;;  %s2178_s15 = int_to_ptr.vmem [resolvable:$true] %s261_s15 }
  0x11   : > { %s293_s18 = sshll.u32 %s2078_s17, 4  ;;  %s2479_s1 = sld [smem:[#allocation17_spill]]  ;;  %s2189_s18 = int_to_ptr.vmem [resolvable:$true] %s293_s18 }
  0x12   : > { %s2477_s13 = scalar_select %p2174_p3, 1, 0 }
  0x13   : > { %p1607_p4 = pneg %p2174_p3 }
  0x15   : > { %p2185_p6 = pnand %p1607_p4, %p2169_p1 }
  0x17   : > { %s1843_s21 = scalar_lea.hbm %s2479_s1, 2048  ;;  %p2199_p8 = pneg %p2185_p6 }
  0x18   : > { %p1844_p7 = scmp.ne.s32.totalorder %s2479_s1, %s1843_s21  ;;  %p1850_p11 = scmp.lt.u32.totalorder %s1843_s21, %s2479_s1 }
  0x1a   : > { %p1846_p9 = pnand %p2199_p8, %p1844_p7 }
  0x1c   : > { %p1847_p10 = pneg %p1846_p9 }
  0x1e   : > { %p1852_p12 = pnand %p1850_p11, %p1847_p10 }
  0x20   : > { %1855 = shalt.err (!%p1852_p12)
}
  0x21   : > { %s1856_s14 = scalar_lea.vmem %s2178_s15, 2048  ;;  %p1864_p4 = scmp.lt.s32.totalorder %s2178_s15, %s2178_s15 }
  0x22   : > { %p1857_p13 = scmp.ne.s32.totalorder %s2178_s15, %s1856_s14  ;;  %p1865_p5 = scmp.lt.s32.totalorder %s1856_s14, %s1856_s14 }
  0x24   : > { %p1859_p0 = pnand %p1857_p13, %p2199_p8  ;;  %p1866_p7 = por %p1865_p5, %p1864_p4 }
  0x26   : > { %p1860_p2 = pneg %p1859_p0 }
  0x28   : > { %p1867_p9 = pnand %p1866_p7, %p1860_p2 }
  0x2a   : > { %1870 = shalt.err (!%p1867_p9)
}
  0x2b   : > { %s2467_s17 = smov 128   ;;  %s2468_s19 = smov 8  }
  0x2c   : > { %1610 = dma.hbm_to_vmem [thread:$0]  (!%p2185_p6), %s2479_s1, 2048, %s2178_s15, [#allocation7], %s2467_s17, %s2467_s17, %s2468_s19  }
  0x2d   : > { %s1871_s25 = scalar_lea.hbm %s2461_s5, 2048 }
  0x2e   : > { %p1872_p5 = scmp.ne.s32.totalorder %s2461_s5, %s1871_s25  ;;  %p1878_p12 = scmp.lt.u32.totalorder %s1871_s25, %s2461_s5 }
  0x30   : > { %p1874_p10 = pnand %p1872_p5, %p2199_p8 }
  0x32   : > { %p1875_p11 = pneg %p1874_p10 }
  0x34   : > { %p1880_p13 = pnand %p1878_p12, %p1875_p11 }
  0x36   : > { %1883 = shalt.err (!%p1880_p13)
}
  0x37   : > { %s1884_s15 = scalar_lea.vmem %s2189_s18, 2048  ;;  %p1892_p7 = scmp.lt.s32.totalorder %s2189_s18, %s2189_s18 }
  0x38   : > { %p1885_p0 = scmp.ne.s32.totalorder %s2189_s18, %s1884_s15  ;;  %p1893_p9 = scmp.lt.s32.totalorder %s1884_s15, %s1884_s15 }
  0x3a   : > { %p1887_p2 = pnand %p1885_p0, %p2199_p8  ;;  %p1894_p5 = por %p1893_p9, %p1892_p7 }
  0x3c   : > { %p1888_p4 = pneg %p1887_p2 }
  0x3e   : > { %p1895_p10 = pnand %p1894_p5, %p1888_p4 }
  0x40   : > { %1898 = shalt.err (!%p1895_p10)
}
  0x41   : > { %s2081_s20 = smov 64   ;;  %s2082_s8 = smov 4  }
  0x42   : > { %1616 = dma.hbm_to_vmem [thread:$0]  (!%p2185_p6), %s2461_s5, 2048, %s2189_s18, [#allocation10], %s2081_s20, %s2081_s20, %s2082_s8  }
  0x43   : > { %s2083_s22 = smov [#allocation8]   ;;  %s2084_s25 = smov [#allocation11]  }
  0x44   : > { %s277_s23 = sshll.u32 %s2083_s22, 4  ;;  %s312_s26 = sshll.u32 %s2084_s25, 4  ;;  %s278_s23 = int_to_ptr.vmem [resolvable:$true] %s277_s23  ;;  %s2246_s26 = int_to_ptr.vmem [resolvable:$true] %s312_s26 }
  0x45   : > { %s2481_s3 = sld [smem:[#allocation18_spill]] }
  0x4b   : > { %s1899_s17 = scalar_lea.hbm %s2481_s3, 4096 }
  0x4c   : > { %p1900_p11 = scmp.ne.s32.totalorder %s2481_s3, %s1899_s17  ;;  %p1906_p0 = scmp.lt.u32.totalorder %s1899_s17, %s2481_s3 }
  0x4e   : > { %p1902_p12 = pnand %p1900_p11, %p2199_p8 }
  0x50   : > { %p1903_p13 = pneg %p1902_p12 }
  0x52   : > { %p1908_p2 = pnand %p1906_p0, %p1903_p13 }
  0x54   : > { %1911 = shalt.err (!%p1908_p2)
}
  0x55   : > { %s1912_s20 = scalar_lea.vmem %s278_s23, 4096  ;;  %p1920_p5 = scmp.lt.s32.totalorder %s278_s23, %s278_s23 }
  0x56   : > { %p1913_p4 = scmp.ne.s32.totalorder %s278_s23, %s1912_s20  ;;  %p1921_p10 = scmp.lt.s32.totalorder %s1912_s20, %s1912_s20 }
  0x58   : > { %p1915_p7 = pnand %p1913_p4, %p2199_p8  ;;  %p1922_p3 = por %p1921_p10, %p1920_p5 }
  0x5a   : > { %p1916_p9 = pneg %p1915_p7 }
  0x5c   : > { %p1923_p1 = pnand %p1922_p3, %p1916_p9 }
  0x5e   : > { %1926 = shalt.err (!%p1923_p1)
}
  0x5f   : > { %s2482_s1 = smov 8   ;;  %s2483_s19 = smov 128  }
  0x60   : > { %1613 = dma.hbm_to_vmem [thread:$0]  (!%p2185_p6), %s2481_s3, 4096, %s278_s23, [#allocation7], %s2483_s19, %s2483_s19, %s2482_s1  }
  0x61   : > { %s1927_s25 = scalar_lea.hbm %s2463_s7, 4096 }
  0x62   : > { %p1928_p11 = scmp.ne.s32.totalorder %s2463_s7, %s1927_s25  ;;  %p1934_p12 = scmp.lt.u32.totalorder %s1927_s25, %s2463_s7 }
  0x64   : > { %p1930_p1 = pnand %p1928_p11, %p2199_p8 }
  0x66   : > { %p1931_p3 = pneg %p1930_p1 }
  0x68   : > { %p1936_p13 = pnand %p1934_p12, %p1931_p3 }
  0x6a   : > { %1939 = shalt.err (!%p1936_p13)
}
  0x6b   : > { %s1940_s23 = scalar_lea.vmem %s2246_s26, 4096  ;;  %p1948_p7 = scmp.lt.s32.totalorder %s2246_s26, %s2246_s26 }
  0x6c   : > { %p1941_p0 = scmp.ne.s32.totalorder %s2246_s26, %s1940_s23  ;;  %p1949_p9 = scmp.lt.s32.totalorder %s1940_s23, %s1940_s23 }
  0x6e   : > { %p1943_p2 = pnand %p1941_p0, %p2199_p8  ;;  %p1950_p5 = por %p1949_p9, %p1948_p7 }
  0x70   : > { %p1944_p4 = pneg %p1943_p2 }
  0x72   : > { %p1951_p10 = pnand %p1950_p5, %p1944_p4 }
  0x74   : > { %1954 = shalt.err (!%p1951_p10)
}
  0x75   : > { %s2085_s20 = smov 256   ;;  %s2086_s24 = smov 16  }
  0x76   : > { %1619 = dma.hbm_to_vmem [thread:$0]  (!%p2185_p6), %s2463_s7, 4096, %s2246_s26, [#allocation10], %s2085_s20, %s2085_s20, %s2086_s24  }
  0x77   : > { %s1442_s8 = sadd.s32 4294967294, %s2075_s10   ;;  %s38_s17 = sadd.s32 1, %s2071_s9 }
  0x78   : > { %p40_p8 = scmp.ge.s32.totalorder %s38_s17, 2  ;;  %s45_s21 = sadd.s32 1, %s2063_s29 }
  0x79   : > { %p52_p11 = scmp.ne.s32.totalorder %s2063_s29, %s2059_s28  ;;  %p53_p1 = scmp.eq.s32.totalorder %s2075_s10, 0 }
  0x7a   : > { %s2503_s17 = smov (%p40_p8, %s38_s17), 0  ;;  %p58_p12 = scmp.ne.s32.totalorder %s2059_s28, %s2055_s27 }
  0x7b   : > { %p2300_p3 = por %p53_p1, %p52_p11  ;;  %s42_s16 = ssub.s32 %s2071_s9, %s2503_s17 }
  0x7c   : > { %s2485_s26 = sadd.s32 4294967295, %s2075_s10   ;;  %p43_p13 = scmp.eq.s32.totalorder %s42_s16, 0 }
  0x7d   : > { %p236_p6 = scmp.eq.s32.totalorder %s2485_s26, 1  ;;  %p2486_p0 = scmp.ne.s32.totalorder %s2476_s12, 0 }
  0x7e   : > { %p242_p7 = scmp.eq.s32.totalorder %s1442_s8, 1  ;;  %p1632_p5 = scmp.lt.s32.totalorder %s2075_s10, 2 }
  0x7f   : > { %p2312_p2 = por %p2486_p0, %p58_p12  ;;  %p2316_p4 = por %p236_p6, %p52_p11 }
  0x80   : > { %s2321_s15 = scalar_select %p43_p13, %s2063_s29, %s45_s21  }
  0x81   : > { %s2488_s14 = scalar_select %p2316_p4, 1, 0 }
  0x82   : > { %p2323_p9 = por %p242_p7, %p58_p12  ;;  %s326_s18 = sand.u32 1, %s2063_s29  }
  0x83   : > { %s1450_s23 = sshll.u32 %s2071_s9, 6  ;;  %s1449_s20 = sshll.u32 %s326_s18, 2 }
  0x84   : > { %s2489_s11 = scalar_select %p2323_p9, 1, 0 }
  0x85   : > { %s2333_s19 = scalar_lea.hbm %s2456_s0, %s1450_s23  ;;  %s330_s8 = scalar_lea.vmem [#allocation3], %s1449_s20 }
  0x86   : > { %s337_s21 = sshll.u32 %s330_s8, 4  ;;  %p2337_p10 = pnand %p1632_p5, %p2300_p3  ;;  %s2341_s21 = int_to_ptr.vmem [resolvable:$true] %s337_s21 }
  0x87   : > { %s327_s26 = scalar_lea.sflag [#allocation4], %s326_s18  ;;  %s1955_s3 = scalar_lea.hbm %s2333_s19, 64 }
  0x88   : > { %p1956_p8 = scmp.ne.s32.totalorder %s2333_s19, %s1955_s3  ;;  %p1957_p11 = pneg %p2337_p10 }
  0x89   : > { %s1960_s22 = scalar_lea.hbm %s2456_s0, 128  ;;  %p1961_p3 = scmp.lt.u32.totalorder %s2333_s19, %s2456_s0 }
  0x8a   : > { %p1958_p1 = pnand %p1957_p11, %p1956_p8  ;;  %p1962_p6 = scmp.lt.u32.totalorder %s1960_s22, %s1955_s3 }
  0x8b   : > { %p1964_p0 = scmp.lt.u32.totalorder %s1955_s3, %s2333_s19 }
  0x8c   : > { %p1959_p12 = pneg %p1958_p1  ;;  %p1963_p13 = por %p1962_p6, %p1961_p3 }
  0x8e   : > { %p1965_p7 = por %p1964_p0, %p1963_p13 }
  0x90   : > { %p1966_p5 = pnand %p1965_p7, %p1959_p12 }
  0x92   : > { %1969 = shalt.err (!%p1966_p5)
}
  0x93   : > { %s1970_s18 = scalar_lea.vmem %s2341_s21, 64  ;;  %s2087_s8 = smov [#allocation3]  }
  0x94   : > { %p1971_p8 = scmp.ne.s32.totalorder %s2341_s21, %s1970_s18  ;;  %s1975_s23 = sshll.u32 %s2087_s8, 4  ;;  %s1976_s23 = int_to_ptr.vmem [resolvable:$false] %s1975_s23 }
  0x95   : > { %s1977_s20 = scalar_lea.vmem %s1976_s23, 128  ;;  %p1978_p4 = scmp.lt.s32.totalorder %s2341_s21, %s1976_s23 }
  0x96   : > { %p1973_p1 = pnand %p1971_p8, %p1957_p11  ;;  %p1979_p3 = scmp.lt.s32.totalorder %s1977_s20, %s1970_s18 }
  0x98   : > { %p1974_p9 = pneg %p1973_p1  ;;  %p1980_p6 = por %p1979_p3, %p1978_p4 }
  0x9a   : > { %p1981_p13 = pnand %p1980_p6, %p1974_p9 }
  0x9c   : > { %1984 = shalt.err (!%p1981_p13)
}
  0x9d   : > { %1623 = dma.hbm_to_vmem [thread:$0]  (!%p2337_p10), %s2333_s19, 64, %s2341_s21, %s327_s26  }
  0x9e   : > { %p2491_p12 = scmp.ne.s32.totalorder %s2477_s13, 0 }
  0x9f   : > { %s2371_s3 = sand.u32 (!%p2491_p12), 1, %s2059_s28  }
  0xa0   : > { %346 = sbr.rel (%p2491_p12) target bundleno = 1291 (0x50b), region = 52  ;;  %s1452_s22 = sshll.u32 (!%p2491_p12), %s2371_s3, 2 }
  0xa1   : > { %s349_s24 = scalar_lea.sflag (!%p2491_p12), [#allocation4], %s2371_s3  ;;  %s2375_s1 = scalar_lea.vmem (!%p2491_p12), [#allocation3], %s1452_s22 }
  0xa7   : > { %2038 = dma.done.wait (%p2312_p2), %s349_s24, 64  }
  0xa8   : > { %2040 = vsyncadd (%p2312_p2), %s349_s24, 4294967232  ;;  %p2492_p4 = scmp.ne.s32.totalorder %s2476_s12, 0 }
  0xaa   : > { %2042 = dma.done.wait (%p2492_p4), [#allocation7], 6144  }
  0xab   : > { %2044 = vsyncadd (%p2492_p4), [#allocation7], 4294961152 }
  0xac   : > { %2046 = dma.done.wait (%p2492_p4), [#allocation10], 6144  }
  0xad   : > { %2048 = vsyncadd (%p2492_p4), [#allocation10], 4294961152  ;;  %v2088_v0 = vmov 0   ;;  %v1697_v1 = vld [vmem:[#allocation6 + $0x4] ss:$8 sps:$4 sm:$0xff]   ;;  %v427_v54 = vlaneseq  ;;  %s1457_s26 = sshll.u32 %s2371_s3, 4 }
  0xae   : > { %549 = vmatprep.mubr.bf16.mxu0 %v2088_v0  ;;  %v1699_v2 = vld [vmem:[#allocation6] ss:$8 sps:$4 sm:$0xff]   ;;  %517 = vmatprep.subr.bf16.mxu0 %v1697_v1  ;;  %v1700_v3 = vld [vmem:[#allocation6 + $0x14] ss:$8 sps:$4 sm:$0xff]   ;;  %v1702_v4 = vld [vmem:[#allocation6 + $0x10] ss:$8 sps:$4 sm:$0xff]  }
  0xaf   : > { %518 = vmatpush1.bf16.msra.mxu0 %v1699_v2  ;;  %v1703_v5 = vld [vmem:[#allocation6 + $0x24] ss:$8 sps:$4 sm:$0xff]   ;;  %v1705_v6 = vld [vmem:[#allocation6 + $0x20] ss:$8 sps:$4 sm:$0xff]   ;;  %v1706_v7 = vld [vmem:[#allocation6 + $0x34] ss:$8 sps:$4 sm:$0xff]  }
  0xb0   : > { %519 = vmatprep.subr.bf16.mxu0 %v1700_v3  ;;  %v1708_v8 = vld [vmem:[#allocation6 + $0x30] ss:$8 sps:$4 sm:$0xff]   ;;  %v1709_v9 = vld [vmem:[#allocation6 + $0x44] ss:$8 sps:$4 sm:$0xff]   ;;  %v1723_v11 = vld [vmem:[#allocation8] ss:$8 sps:$4 sm:$0xff]  }
  0xb1   : > { %v1721_v10 = vld [vmem:[#allocation8 + $0x4] ss:$8 sps:$4 sm:$0xff]   ;;  %v1724_v12 = vld [vmem:[#allocation8 + $0x14] ss:$8 sps:$4 sm:$0xff]   ;;  %v1711_v13 = vld [vmem:[#allocation6 + $0x40] ss:$8 sps:$4 sm:$0xff]  }
  0xb2   : > { %774 = vmatprep.subr.bf16.mxu1 %v1721_v10  ;;  %v1726_v14 = vld [vmem:[#allocation8 + $0x10] ss:$8 sps:$4 sm:$0xff]   ;;  %v1727_v15 = vld [vmem:[#allocation8 + $0x24] ss:$8 sps:$4 sm:$0xff]   ;;  %v1712_v16 = vld [vmem:[#allocation6 + $0x54] ss:$8 sps:$4 sm:$0xff]  }
  0xb3   : > { %520 = vmatpush1.bf16.msra.mxu0 %v1702_v4  ;;  %775 = vmatpush1.bf16.msra.mxu1 %v1723_v11  ;;  %v1714_v17 = vld [vmem:[#allocation6 + $0x50] ss:$8 sps:$4 sm:$0xff]   ;;  %v1729_v18 = vld [vmem:[#allocation8 + $0x20] ss:$8 sps:$4 sm:$0xff]   ;;  %v1730_v19 = vld [vmem:[#allocation8 + $0x34] ss:$8 sps:$4 sm:$0xff]  }
  0xb4   : > { %521 = vmatprep.subr.bf16.mxu0 %v1703_v5  ;;  %776 = vmatprep.subr.bf16.mxu1 %v1724_v12  ;;  %v1715_v20 = vld [vmem:[#allocation6 + $0x64] ss:$8 sps:$4 sm:$0xff]   ;;  %v1717_v21 = vld [vmem:[#allocation6 + $0x60] ss:$8 sps:$4 sm:$0xff]   ;;  %v1732_v22 = vld [vmem:[#allocation8 + $0x30] ss:$8 sps:$4 sm:$0xff]  }
  0xb5   : > { %v1733_v23 = vld [vmem:[#allocation8 + $0x44] ss:$8 sps:$4 sm:$0xff]   ;;  %v1718_v24 = vld [vmem:[#allocation6 + $0x74] ss:$8 sps:$4 sm:$0xff]   ;;  %v1735_v25 = vld [vmem:[#allocation8 + $0x40] ss:$8 sps:$4 sm:$0xff]  }
  0xb6   : > { %v1720_v26 = vld [vmem:[#allocation6 + $0x70] ss:$8 sps:$4 sm:$0xff]   ;;  %v1736_v27 = vld [vmem:[#allocation8 + $0x54] ss:$8 sps:$4 sm:$0xff]   ;;  %v1739_v30 = vld [vmem:[#allocation8 + $0x64] ss:$8 sps:$4 sm:$0xff]  }
  0xb7   : > { %522 = vmatpush1.bf16.msra.mxu0 %v1705_v6  ;;  %777 = vmatpush1.bf16.msra.mxu1 %v1726_v14  ;;  %v1738_v28 = vld [vmem:[#allocation8 + $0x50] ss:$8 sps:$4 sm:$0xff]   ;;  %v1741_v31 = vld [vmem:[#allocation8 + $0x60] ss:$8 sps:$4 sm:$0xff]   ;;  %v1742_v32 = vld [vmem:[#allocation8 + $0x74] ss:$8 sps:$4 sm:$0xff]  }
  0xb8   : > { %523 = vmatprep.subr.bf16.mxu0 %v1706_v7  ;;  %778 = vmatprep.subr.bf16.mxu1 %v1727_v15  ;;  %v408_v29 = vld [vmem:[%s2375_s1] sm:$0xf]  ;;  %v1745_v34 = vld [vmem:[#allocation8 + $0x84] ss:$8 sps:$4 sm:$0xff]   ;;  %v1747_v35 = vld [vmem:[#allocation8 + $0x80] ss:$8 sps:$4 sm:$0xff]  }
  0xb9   : > { %v1744_v33 = vld [vmem:[#allocation8 + $0x70] ss:$8 sps:$4 sm:$0xff]   ;;  %v1748_v36 = vld [vmem:[#allocation8 + $0x94] ss:$8 sps:$4 sm:$0xff]   ;;  %v1751_v38 = vld [vmem:[#allocation8 + $0xa4] ss:$8 sps:$4 sm:$0xff]  }
  0xba   : > { %v1750_v37 = vld [vmem:[#allocation8 + $0x90] ss:$8 sps:$4 sm:$0xff]   ;;  %v1753_v39 = vld [vmem:[#allocation8 + $0xa0] ss:$8 sps:$4 sm:$0xff]   ;;  %v1754_v40 = vld [vmem:[#allocation8 + $0xb4] ss:$8 sps:$4 sm:$0xff]  }
  0xbb   : > { %524 = vmatpush1.bf16.msra.mxu0 %v1708_v8  ;;  %779 = vmatpush1.bf16.msra.mxu1 %v1729_v18  ;;  %v1756_v41 = vld [vmem:[#allocation8 + $0xb0] ss:$8 sps:$4 sm:$0xff]   ;;  %v1757_v42 = vld [vmem:[#allocation8 + $0xc4] ss:$8 sps:$4 sm:$0xff]   ;;  %v1759_v43 = vld [vmem:[#allocation8 + $0xc0] ss:$8 sps:$4 sm:$0xff]  }
  0xbc   : > { %525 = vmatprep.subr.bf16.mxu0 %v1709_v9  ;;  %780 = vmatprep.subr.bf16.mxu1 %v1730_v19  ;;  %v1760_v44 = vld [vmem:[#allocation8 + $0xd4] ss:$8 sps:$4 sm:$0xff]   ;;  %v1762_v45 = vld [vmem:[#allocation8 + $0xd0] ss:$8 sps:$4 sm:$0xff]   ;;  %v1763_v46 = vld [vmem:[#allocation8 + $0xe4] ss:$8 sps:$4 sm:$0xff]  }
  0xbd   : > { %v1765_v47 = vld [vmem:[#allocation8 + $0xe0] ss:$8 sps:$4 sm:$0xff]   ;;  %v1766_v48 = vld [vmem:[#allocation8 + $0xf4] ss:$8 sps:$4 sm:$0xff]   ;;  %v1768_v49 = vld [vmem:[#allocation8 + $0xf0] ss:$8 sps:$4 sm:$0xff]  }
  0xbe   : > { %v1769_v50 = vld [vmem:[#allocation9 + $0x40] sm:$0xff]   ;;  %v1771_v52 = vld [vmem:[#allocation9 + $0x48] sm:$0xff]   ;;  %v428_v55 = vshrl.u32 %v427_v54, 7  ;;  %v425_v57 = vld [vmem:[%s2458_s2] sm:$0x3]  ;;  %s1564_s18 = sshll.u32 %s2067_s30, 8 }
  0xbf   : > { %526 = vmatpush1.bf16.msra.mxu0 %v1711_v13  ;;  %781 = vmatpush1.bf16.msra.mxu1 %v1732_v22  ;;  %v1770_v51 = vld [vmem:[#allocation9] sm:$0xff]   ;;  %v1772_v53 = vld [vmem:[#allocation9 + $0x8] sm:$0xff]   ;;  %v1775_v18 = vld [vmem:[#allocation9 + $0x58] sm:$0xff]   ;;  %s400_s8 = scalar_lea.vmem [#allocation12], %s1457_s26  ;;  %s2493_s24 = sld [smem:[#allocation19_spill]] }
  0xc0   : > { %527 = vmatprep.subr.bf16.mxu0 %v1712_v16  ;;  %782 = vmatprep.subr.bf16.mxu1 %v1733_v23  ;;  %v429_v56 = vsub.s32 0, %v428_v55  ;;  %v433_v58 = vsub.s32 1, %v428_v55  ;;  %v1773_v16 = vld [vmem:[#allocation9 + $0x50] sm:$0xff]   ;;  %v1776_v19 = vld [vmem:[#allocation9 + $0x18] sm:$0xff]   ;;  %v1779_v22 = vld [vmem:[#allocation9 + $0x68] sm:$0xff]   ;;  %s1320_s23 = sshll.u32 %s400_s8, 4  ;;  %s2409_s23 = int_to_ptr.vmem [resolvable:$true] %s1320_s23 }
  0xc1   : > { %v1780_v23 = vld [vmem:[#allocation9 + $0x28] sm:$0xff]   ;;  %v1791_v55 = vld [vmem:[#allocation11 + $0x20] ss:$16 sps:$4 sm:$0xff]   ;;  %s1304_s30 = scalar_lea.sflag [#allocation5], %s2371_s3  ;;  %s1985_s12 = scalar_lea.vmem %s2409_s23, 256 }
  0xc2   : > { %v430_v59 = vrot.slane %v425_v57, %v429_v56  ;;  %v434_v60 = vrot.slane %v425_v57, %v433_v58  ;;  %v1796_v54 = vld [vmem:[#allocation11 + $0x2c] ss:$16 sps:$4 sm:$0xff]   ;;  %p1986_p2 = scmp.ne.s32.totalorder %s2409_s23, %s1985_s12  ;;  %p2494_p9 = scmp.ne.s32.totalorder %s2488_s14, 0 }
  0xc3   : > { %528 = vmatpush1.bf16.msra.mxu0 %v1714_v17  ;;  %783 = vmatpush1.bf16.msra.mxu1 %v1735_v25  ;;  %v1774_v17 = vld [vmem:[#allocation9 + $0x10] sm:$0xff]   ;;  %s2089_s13 = smov [#allocation12]  }
  0xc4   : > { %529 = vmatprep.subr.bf16.mxu0 %v1715_v20  ;;  %784 = vmatprep.subr.bf16.mxu1 %v1736_v27  ;;  %v1777_v20 = vld [vmem:[#allocation9 + $0x60] sm:$0xff]   ;;  %v1782_v25 = vld [vmem:[#allocation9 + $0x30] sm:$0xff]   ;;  %v1784_v27 = vld [vmem:[#allocation9 + $0x38] sm:$0xff]   ;;  %p1987_p10 = pnand %p1986_p2, %p2494_p9  ;;  %s1989_s25 = sshll.u32 %s2089_s13, 4  ;;  %s1990_s25 = int_to_ptr.vmem [resolvable:$false] %s1989_s25 }
  0xc5   : > { %s2407_s1 = scalar_lea.hbm %s2493_s24, %s1564_s18  ;;  %s1991_s19 = scalar_lea.vmem %s1990_s25, 512 }
  0xc6   : > { %p1988_p11 = pneg %p1987_p10  ;;  %p1992_p0 = scmp.lt.s32.totalorder %s2409_s23, %s1990_s25 }
  0xc7   : > { %530 = vmatpush1.bf16.msra.mxu0 %v1717_v21  ;;  %785 = vmatpush1.bf16.msra.mxu1 %v1738_v28  ;;  %v1778_v21 = vld [vmem:[#allocation9 + $0x20] sm:$0xff]   ;;  %v602_v28 = vld [vmem:[%s2460_s4] sm:$0x3]  ;;  %p1993_p7 = scmp.lt.s32.totalorder %s1991_s19, %s1985_s12 }
  0xc8   : > { %531 = vmatprep.subr.bf16.mxu0 %v1718_v24  ;;  %786 = vmatprep.subr.bf16.mxu1 %v1739_v30  ;;  %v1781_v24 = vld [vmem:[#allocation9 + $0x70] sm:$0xff]   ;;  %v611_v30 = vrot.slane %v602_v28, %v433_v58 }
  0xc9   : > { %p1994_p5 = por %p1993_p7, %p1992_p0 }
  0xcb   : > { %532 = vmatpush1.bf16.msra.mxu0 %v1720_v26  ;;  %787 = vmatpush1.bf16.msra.mxu1 %v1741_v31  ;;  %v1783_v26 = vld [vmem:[#allocation9 + $0x78] sm:$0xff]   ;;  %p1995_p8 = pnand %p1994_p5, %p1988_p11 }
  0xcc   : > { %788 = vmatprep.subr.bf16.mxu1 %v1742_v32  ;;  %1565 = vmatprep.subr.bf16.mxu0 %v1769_v50  ;;  %v1787_v50 = vld [vmem:[#allocation11 + $0x4] ss:$16 sps:$4 sm:$0xff]  }
  0xce   : > { %550 = vmatmul.mubr.bf16.vlgmr.msra.gmra.mrb[0].mxu0 %v408_v29  ;;  %v607_v29 = vrot.slane %v602_v28, %v429_v56  ;;  %v1794_v56 = vld [vmem:[#allocation11 + $0x28] ss:$16 sps:$4 sm:$0xff]  }
  0xcf   : > { %789 = vmatpush1.bf16.msra.mxu1 %v1744_v33  ;;  %1566 = vmatpush3.bf16.msra.mxu0 %v1770_v51  ;;  %v1788_v51 = vld [vmem:[#allocation11 + $0x8] ss:$16 sps:$4 sm:$0xff]  }
  0xd0   : > { %790 = vmatprep.subr.bf16.mxu1 %v1745_v34  ;;  %1567 = vmatprep.subr.bf16.mxu0 %v1771_v52  ;;  %v1790_v52 = vld [vmem:[#allocation11 + $0xc] ss:$16 sps:$4 sm:$0xff]  }
  0xd3   : > { %791 = vmatpush1.bf16.msra.mxu1 %v1747_v35  ;;  %1568 = vmatpush3.bf16.msra.mxu0 %v1772_v53  ;;  %v1793_v53 = vld [vmem:[#allocation11 + $0x24] ss:$16 sps:$4 sm:$0xff]  }
  0xd4   : > { %792 = vmatprep.subr.bf16.mxu1 %v1748_v36  ;;  %1569 = vmatprep.subr.bf16.mxu0 %v1773_v16  ;;  %v1818_v16 = vld [vmem:[#allocation11 + $0xa8] ss:$16 sps:$4 sm:$0xff]  }
  0xd7   : > { %793 = vmatpush1.bf16.msra.mxu1 %v1750_v37  ;;  %1570 = vmatpush3.bf16.msra.mxu0 %v1774_v17  ;;  %v1823_v17 = vld [vmem:[#allocation11 + $0xc4] ss:$16 sps:$4 sm:$0xff]  }
  0xd8   : > { %794 = vmatprep.subr.bf16.mxu1 %v1751_v38  ;;  %1571 = vmatprep.subr.bf16.mxu0 %v1775_v18  ;;  %v1826_v18 = vld [vmem:[#allocation11 + $0xcc] ss:$16 sps:$4 sm:$0xff]  }
  0xdb   : > { %795 = vmatpush1.bf16.msra.mxu1 %v1753_v39  ;;  %1572 = vmatpush3.bf16.msra.mxu0 %v1776_v19  ;;  %v1821_v19 = vld [vmem:[#allocation11 + $0xc0] ss:$16 sps:$4 sm:$0xff]  }
  0xdc   : > { %796 = vmatprep.subr.bf16.mxu1 %v1754_v40  ;;  %1573 = vmatprep.subr.bf16.mxu0 %v1777_v20  ;;  %v1824_v20 = vld [vmem:[#allocation11 + $0xc8] ss:$16 sps:$4 sm:$0xff]  }
  0xdf   : > { %797 = vmatpush1.bf16.msra.mxu1 %v1756_v41  ;;  %1574 = vmatpush3.bf16.msra.mxu0 %v1778_v21  ;;  %v1829_v21 = vld [vmem:[#allocation11 + $0xe4] ss:$16 sps:$4 sm:$0xff]  }
  0xe0   : > { %798 = vmatprep.subr.bf16.mxu1 %v1757_v42  ;;  %1575 = vmatprep.subr.bf16.mxu0 %v1779_v22  ;;  %v1827_v22 = vld [vmem:[#allocation11 + $0xe0] ss:$16 sps:$4 sm:$0xff]  }
  0xe3   : > { %799 = vmatpush1.bf16.msra.mxu1 %v1759_v43  ;;  %1576 = vmatpush3.bf16.msra.mxu0 %v1780_v23  ;;  %v1830_v23 = vld [vmem:[#allocation11 + $0xe8] ss:$16 sps:$4 sm:$0xff]  }
  0xe4   : > { %800 = vmatprep.subr.bf16.mxu1 %v1760_v44  ;;  %1577 = vmatprep.subr.bf16.mxu0 %v1781_v24  ;;  %v1832_v24 = vld [vmem:[#allocation11 + $0xec] ss:$16 sps:$4 sm:$0xff]  }
  0xe7   : > { %801 = vmatpush1.bf16.msra.mxu1 %v1762_v45  ;;  %1578 = vmatpush3.bf16.msra.mxu0 %v1782_v25 }
  0xe8   : > { %802 = vmatprep.subr.bf16.mxu1 %v1763_v46  ;;  %1579 = vmatprep.subr.bf16.mxu0 %v1783_v26 }
  0xeb   : > { %803 = vmatpush1.bf16.msra.mxu1 %v1765_v47  ;;  %1580 = vmatpush3.bf16.msra.mxu0 %v1784_v27 }
  0xec   : > { %804 = vmatprep.subr.bf16.mxu1 %v1766_v48  ;;  %1203 = vmatprep.subr.bf16.mxu0 %v1787_v50 }
  0xef   : > { %805 = vmatpush1.bf16.msra.mxu1 %v1768_v49  ;;  %v1785_v49 = vld [vmem:[#allocation11] ss:$16 sps:$4 sm:$0xff]  }
  0xf0   : > { %1244 = vmatprep.subr.bf16.mxu1 %v1790_v52 }
 0x1a1   : > { %v551_v61 = vpop.f32.mrb[0].mxu0 }
 0x1a2   : > { %v552_v62 = vadd.f32 %v551_v61, %v430_v59  ;;  %v553_v63 = vpop.f32.mrb[1].mxu0 }
 0x1a3   : > { %v554_v1 = vadd.f32 %v553_v63, %v434_v60  ;;  %v555_v2 = vpop.f32.mrb[2].mxu0 }
 0x1a4   : > { %v560_v3 = vmul.f32 0.70710677, %v552_v62  ;;  %v556_v4 = vpop.f32.mrb[3].mxu0  ;;  %v558_v8 = vmul.f32 0.5, %v552_v62  ;;  %v1802_v2 = vld [vmem:[#allocation11 + $0x4c] ss:$16 sps:$4 sm:$0xff]  }
 0x1a5   : > { %v561_v5 = vmul.f32 0.70710677, %v554_v1  ;;  %v559_v10 = vmul.f32 0.5, %v554_v1  ;;  %v1799_v1 = vld [vmem:[#allocation11 + $0x44] ss:$16 sps:$4 sm:$0xff]  }
 0x1a6   : > { %1833 = verf.f32 %v560_v3  ;;  %v1797_v3 = vld [vmem:[#allocation11 + $0x40] ss:$16 sps:$4 sm:$0xff]   ;;  %v1800_v4 = vld [vmem:[#allocation11 + $0x48] ss:$16 sps:$4 sm:$0xff]  }
 0x1a7   : > { %1835 = verf.f32 %v561_v5  ;;  %v1805_v5 = vld [vmem:[#allocation11 + $0x64] ss:$16 sps:$4 sm:$0xff]  }
 0x1b0   : > { %v1834_v6 = vpop.eup %1833 }
 0x1b1   : > { %v1836_v7 = vpop.eup %1835  ;;  %v564_v9 = vadd.f32 1.0, %v1834_v6  ;;  %v1808_v6 = vld [vmem:[#allocation11 + $0x6c] ss:$16 sps:$4 sm:$0xff]  }
 0x1b2   : > { %v565_v11 = vadd.f32 1.0, %v1836_v7  ;;  %v1803_v7 = vld [vmem:[#allocation11 + $0x60] ss:$16 sps:$4 sm:$0xff]  }
 0x1b3   : > { %v566_v12 = vmul.f32 %v564_v9, %v558_v8  ;;  %v1806_v8 = vld [vmem:[#allocation11 + $0x68] ss:$16 sps:$4 sm:$0xff]   ;;  %v1811_v9 = vld [vmem:[#allocation11 + $0x84] ss:$16 sps:$4 sm:$0xff]  }
 0x1b4   : > { %v567_v13 = vmul.f32 %v565_v11, %v559_v10  ;;  %v1814_v10 = vld [vmem:[#allocation11 + $0x8c] ss:$16 sps:$4 sm:$0xff]   ;;  %v1809_v11 = vld [vmem:[#allocation11 + $0x80] ss:$16 sps:$4 sm:$0xff]  }
 0x1b5   : > { %v568_v15 = vpack.c.bf16 %v566_v12, %v566_v12  ;;  %v1812_v12 = vld [vmem:[#allocation11 + $0x88] ss:$16 sps:$4 sm:$0xff]  }
 0x1b6   : > { %v569_v14 = vpack.c.bf16 %v567_v13, %v567_v13  ;;  %v1817_v13 = vld [vmem:[#allocation11 + $0xa4] ss:$16 sps:$4 sm:$0xff]  }
 0x1b8   : > { %806 = vmatprep.mubr.bf16.mxu1 %v569_v14  ;;  %v1820_v14 = vld [vmem:[#allocation11 + $0xac] ss:$16 sps:$4 sm:$0xff]  }
 0x1b9   : > { %807 = vmatmul.mubr.bf16.vlgmr.msra.gmra.mrb[0].mxu1 %v568_v15  ;;  %v1815_v15 = vld [vmem:[#allocation11 + $0xa0] ss:$16 sps:$4 sm:$0xff]  }
 0x1ba   : > { %1276 = vmatprep.mubr.bf16.mxu1 %v2088_v0  ;;  %1245 = vmatpush1.bf16.msra.mxu1 %v1788_v51 }
 0x1bb   : > { %1246 = vmatprep.subr.bf16.mxu1 %v1796_v54 }
 0x1be   : > { %1247 = vmatpush1.bf16.msra.mxu1 %v1794_v56 }
 0x1bf   : > { %1248 = vmatprep.subr.bf16.mxu1 %v1802_v2 }
 0x1c2   : > { %1249 = vmatpush1.bf16.msra.mxu1 %v1800_v4 }
 0x1c3   : > { %1250 = vmatprep.subr.bf16.mxu1 %v1808_v6 }
 0x1c6   : > { %1251 = vmatpush1.bf16.msra.mxu1 %v1806_v8 }
 0x1c7   : > { %1252 = vmatprep.subr.bf16.mxu1 %v1814_v10 }
 0x1ca   : > { %1253 = vmatpush1.bf16.msra.mxu1 %v1812_v12 }
 0x1cb   : > { %1254 = vmatprep.subr.bf16.mxu1 %v1820_v14 }
 0x1ce   : > { %1255 = vmatpush1.bf16.msra.mxu1 %v1818_v16 }
 0x1cf   : > { %1256 = vmatprep.subr.bf16.mxu1 %v1826_v18 }
 0x1d2   : > { %1257 = vmatpush1.bf16.msra.mxu1 %v1824_v20 }
 0x1d3   : > { %1258 = vmatprep.subr.bf16.mxu1 %v1832_v24 }
 0x1d6   : > { %1259 = vmatpush1.bf16.msra.mxu1 %v1830_v23 }
 0x28c   : > { %v808_v31 = vpop.f32.mrb[0].mxu1 }
 0x28d   : > { %v809_v32 = vadd.f32 %v808_v31, %v607_v29  ;;  %v810_v33 = vpop.f32.mrb[1].mxu1 }
 0x28e   : > { %v811_v34 = vadd.f32 %v810_v33, %v611_v30  ;;  %v812_v35 = vpop.f32.mrb[2].mxu1 }
 0x28f   : > { %v817_v36 = vmul.f32 0.70710677, %v809_v32  ;;  %v813_v37 = vpop.f32.mrb[3].mxu1  ;;  %v815_v41 = vmul.f32 0.5, %v809_v32 }
 0x290   : > { %v818_v38 = vmul.f32 0.70710677, %v811_v34  ;;  %v816_v43 = vmul.f32 0.5, %v811_v34 }
 0x291   : > { %1837 = verf.f32 %v817_v36 }
 0x292   : > { %1839 = verf.f32 %v818_v38 }
 0x29b   : > { %v1838_v39 = vpop.eup %1837 }
 0x29c   : > { %v1840_v40 = vpop.eup %1839  ;;  %v821_v42 = vadd.f32 1.0, %v1838_v39 }
 0x29d   : > { %v822_v44 = vadd.f32 1.0, %v1840_v40 }
 0x29e   : > { %v823_v45 = vmul.f32 %v821_v42, %v815_v41 }
 0x29f   : > { %v824_v46 = vmul.f32 %v822_v44, %v816_v43 }
 0x2a0   : > { %v825_v48 = vpack.c.bf16 %v823_v45, %v823_v45 }
 0x2a1   : > { %v826_v47 = vpack.c.bf16 %v824_v46, %v824_v46 }
 0x2a3   : > { %994 = vmatprep.mubr.bf16.mxu0 %v826_v47 }
 0x2a4   : > { %995 = vmatmul.mubr.bf16.vlgmr.msra.gmra.mrb[4].mxu0 %v825_v48 }
 0x2a5   : > { %1235 = vmatprep.mubr.bf16.mxu0 %v2088_v0  ;;  %1204 = vmatpush1.bf16.msra.mxu0 %v1785_v49  ;;  %v1506_v0 = vld [vmem:[%s2462_s6] ss:$0 sm:$0xff] }
 0x2a6   : > { %1205 = vmatprep.subr.bf16.mxu0 %v1793_v53 }
 0x2a9   : > { %1206 = vmatpush1.bf16.msra.mxu0 %v1791_v55 }
 0x2aa   : > { %1207 = vmatprep.subr.bf16.mxu0 %v1799_v1 }
 0x2ad   : > { %1208 = vmatpush1.bf16.msra.mxu0 %v1797_v3 }
 0x2ae   : > { %1209 = vmatprep.subr.bf16.mxu0 %v1805_v5 }
 0x2b1   : > { %1210 = vmatpush1.bf16.msra.mxu0 %v1803_v7 }
 0x2b2   : > { %1211 = vmatprep.subr.bf16.mxu0 %v1811_v9 }
 0x2b5   : > { %1212 = vmatpush1.bf16.msra.mxu0 %v1809_v11 }
 0x2b6   : > { %1213 = vmatprep.subr.bf16.mxu0 %v1817_v13 }
 0x2b9   : > { %1214 = vmatpush1.bf16.msra.mxu0 %v1815_v15 }
 0x2ba   : > { %1215 = vmatprep.subr.bf16.mxu0 %v1823_v17 }
 0x2bd   : > { %1216 = vmatpush1.bf16.msra.mxu0 %v1821_v19 }
 0x2be   : > { %1217 = vmatprep.subr.bf16.mxu0 %v1829_v21 }
 0x2c1   : > { %1218 = vmatpush1.bf16.msra.mxu0 %v1827_v22 }
 0x377   : > { %v1581_v57 = vpop.f32.mrb[4].mxu0 }
 0x378   : > { %v1582_v58 = vpop.f32.mrb[5].mxu0 }
 0x379   : > { %v1583_v59 = vadd.f32 %v1582_v58, %v1581_v57  ;;  %v1584_v60 = vpop.f32.mrb[6].mxu0 }
 0x37a   : > { %v1585_v61 = vpop.f32.mrb[7].mxu0 }
 0x37b   : > { %v997_v62 = vadd.f32 %v1583_v59, %v1506_v0 }
 0x37d   : > { %v1002_v63 = vmul.f32 %v997_v62, %v997_v62 }
 0x37f   : > { %1003 = vadd.xlane.f32.xlu0 %v1002_v63 }
 0x40c   : > { %v1004_v25 = vpop.xlane.xlu0 %1003 }
 0x40d   : > { %v1005_v26 = vmax.f32 %v1004_v25, 1e-24 }
 0x40f   : > { %1841 = vrsqrt.f32 %v1005_v26 }
 0x419   : > { %v1842_v27 = vpop.eup %1841 }
 0x41a   : > { %v1007_v28 = vmul.f32 %v1842_v27, %v997_v62 }
 0x41c   : > { %v1008_v29 = vpack.c.bf16 %v1007_v28, %v1007_v28 }
 0x41e   : > { %1009 = vst [vmem:[#allocation2] sm:$0xf] %v1008_v29 }
 0x425   : > { %v1010_v30 = vld [vmem:[#allocation2] sm:$0xf] }
 0x426   : > { %1236 = vmatmul.mubr.bf16.vlgmr.msra.gmra.mrb[8].mxu0 %v1010_v30  ;;  %1277 = vmatmul.mubr.bf16.vlgmr.msra.gmra.mrb[4].mxu1 %v1010_v30 }
 0x4f9   : > { %v1237_v31 = vpop.f32.mrb[8].mxu0  ;;  %v1278_v32 = vpop.f32.mrb[4].mxu1 }
 0x4fa   : > { %v1239_v33 = vpop.f32.mrb[9].mxu0  ;;  %v1280_v34 = vpop.f32.mrb[5].mxu1 }
 0x4fb   : > { %v1562_v35 = vpack.c.bf16 %v1239_v33, %v1237_v31  ;;  %v1563_v36 = vpack.c.bf16 %v1280_v34, %v1278_v32  ;;  %v1241_v37 = vpop.f32.mrb[10].mxu0  ;;  %v1282_v38 = vpop.f32.mrb[6].mxu1 }
 0x4fc   : > { %v1242_v39 = vpop.f32.mrb[11].mxu0  ;;  %v1283_v40 = vpop.f32.mrb[7].mxu1 }
 0x4fd   : > { %1301 = vst [vmem:[%s400_s8] sm:$0xff] %v1562_v35  ;;  %1302 = vst [vmem:[%s400_s8 + $0x8] sm:$0xff] %v1563_v36 }
 0x4fe   : > { %1998 = shalt.err (!%p1995_p8)
}
 0x4ff   : > { %s1999_s3 = scalar_lea.hbm %s2407_s1, 256  ;;  %s2003_s26 = scalar_lea.hbm %s2493_s24, 512 }
 0x500   : > { %p2000_p1 = scmp.ne.s32.totalorder %s2407_s1, %s1999_s3  ;;  %p2004_p13 = scmp.lt.u32.totalorder %s2407_s1, %s2493_s24 }
 0x501   : > { %p2005_p12 = scmp.lt.u32.totalorder %s2003_s26, %s1999_s3  ;;  %p2007_p2 = scmp.lt.u32.totalorder %s1999_s3, %s2407_s1 }
 0x502   : > { %p2001_p3 = pnand %p2000_p1, %p2494_p9 }
 0x503   : > { %p2006_p4 = por %p2005_p12, %p2004_p13 }
 0x504   : > { %p2002_p6 = pneg %p2001_p3 }
 0x505   : > { %p2008_p10 = por %p2007_p2, %p2006_p4 }
 0x507   : > { %p2009_p11 = pnand %p2008_p10, %p2002_p6 }
 0x509   : > { %2012 = shalt.err (!%p2009_p11)
}
 0x50a   : > { %1605 = dma.vmem_to_hbm [thread:$0]  (%p2494_p9), %s2409_s23, 256, %s2407_s1, %s1304_s30  }
 0x50b PF: > { %s1332_s20 = sand.u32 1, %s2055_s27   ;;  %p2495_p0 = scmp.ne.s32.totalorder %s2489_s11, 0 }
 0x50c   : > { %p2496_p7 = scmp.ge.s32.totalorder %s2075_s10, 2  ;;  %s1333_s22 = scalar_lea.sflag [#allocation5], %s1332_s20 }
 0x50e   : > { %p1625_p5 = pnand %p2496_p7, %p2495_p0 }
 0x510   : > { %2050 = dma.done.wait (!%p1625_p5), %s1333_s22, 256  }
 0x511   : > { %2052 = vsyncadd (!%p1625_p5), %s1333_s22, 4294967040  ;;  %s26_s10 = sadd.s32 1, %s2075_s10   ;;  %s2497_s27 = smov %s2059_s28 }
 0x512   : > { %p23_p8 = scmp.ge.s32.totalorder %s26_s10, 4   ;;  %s2498_s28 = smov %s2063_s29 }
 0x513   : > { %s2499_s29 = smov %s2321_s15  ;;  %s2500_s30 = smov %s2071_s9 }
 0x514   : > { %s2501_s9 = smov %s2503_s17  ;;  %25 = sbr.rel (!%p23_p8) target bundleno = 12 (0xc), region = 118 }
 0x51b   :  { %1338 = vsyncpa [#allocation4], 1 }
 0x51c   :  { %1340 = vsyncpa [#allocation4 + $0x1], 1 }
 0x51d   :  { %1341 = vsyncpa [#allocation7], 1 }
 0x51e   :  { %1342 = vsyncpa [#allocation10], 1 }
 0x51f   :  { %1343 = vsyncpa [#allocation5], 1 }
 0x520   :  { %1345 = vsyncpa [#allocation5 + $0x1], 1 }

</bundles_post_ra>
